<compile_context>
chip_gen: v6e
topology: v6e:2x2x1
jax: 0.10.0
libtpu: 0.0.40
codegen_flags: <defaults>
</compile_context>

<pallas_src>
import jax
import jax.numpy as jnp
from jax.experimental import pallas as pl
from jax.experimental.pallas import tpu as pltpu


def _round_up(x, m):
    return ((x + m - 1) // m) * m


def _cdiv(a, b):
    return (a + b - 1) // b


def _pad_to(arr, shape):
    pads = [(0, t - s) for s, t in zip(arr.shape, shape)]
    if all(p == (0, 0) for p in pads):
        return arr
    return jnp.pad(arr, pads)


def _sublane_for(dtype):
    # Sub-32-bit dtypes pack along sublanes: f32 -> 8, bf16 -> 16, fp8/int8 -> 32.
    return {4: 8, 2: 16, 1: 32}.get(jnp.dtype(dtype).itemsize, 8)


def _choose_row_tiling(n, tile_n, sublane):
    """Adaptive row tiling: minimal sublane-aligned padding, >=2 even steps."""
    n_r = _round_up(max(n, 1), sublane)
    g = max(1, _cdiv(n_r, tile_n))
    # Guarantee >= 2 grid steps for medium/large N so v7x megacore shards the
    # "parallel" row axis across both TensorCores (harmless on 1-TC chips).
    if g == 1 and n_r >= 2 * 8 * sublane:
        g = 2
    # Prefer an even number of grid steps (equal work per TC on v7x).
    if g > 1 and g % 2 == 1:
        g += 1
    tile_rows = _round_up(_cdiv(n_r, g), sublane)
    n_pad = tile_rows * g
    return tile_rows, n_pad, g


def _make_mlp_kernel(num_layers, compute_dtype):
    """Fused MLP kernel: x_ref, (w_ref, b_ref) * num_layers, o_ref."""

    def kernel(x_ref, *refs):
        o_ref = refs[-1]
        wb = refs[:-1]
        # Cast on the VPU in-kernel: x streams from HBM once in its stored
        # dtype instead of paying a separate wrapper-side cast pass.
        h = x_ref[...].astype(compute_dtype)
        for l in range(num_layers):
            w = wb[2 * l][...]
            b = wb[2 * l + 1][...]
            # MXU matmul with f32 accumulation; bias + ReLU epilogue in f32.
            acc = jnp.dot(h, w, preferred_element_type=jnp.float32) + b
            if l < num_layers - 1:
                h = jnp.maximum(acc, 0.0).astype(compute_dtype)
            else:
                h = acc
        o_ref[...] = h.astype(o_ref.dtype)

    return kernel


def lazy_mlp_forward(x, params, *, tile_n=1024, lane=128,
                     compute_dtype=jnp.bfloat16, out_dtype=None,
                     vmem_limit_bytes=None):
    """Applies the LazyMLP stack to x of shape (N, F_in).

    params: list of (w, b) per layer, w: (F_in_l, F_out_l), b: (F_out_l,) or
            (1, F_out_l). ReLU between layers, none after the last (LazyMLP).
    compute_dtype: dtype fed to the MXU (default bfloat16); accumulation and
                   the bias/ReLU epilogue stay f32.
    out_dtype: dtype of the output slab (default x.dtype; pass bf16 if the
               consumer allows it to halve output writeback).
    """
    n, f_in = x.shape
    num_layers = len(params)
    out_size = params[-1][0].shape[1]
    out_dtype = x.dtype if out_dtype is None else out_dtype
    cdt = jnp.dtype(compute_dtype)

    # Per-layer feature sizes, padded to full 128-lane multiples (MXU K/N).
    feat = [f_in] + [w.shape[1] for w, _ in params]
    feat_pad = [_round_up(f, lane) for f in feat]

    sublane = _sublane_for(cdt)
    tile_rows, n_pad, grid_rows = _choose_row_tiling(n, tile_n, sublane)

    # x stays in its stored dtype; the cast happens inside the kernel.
    x_p = _pad_to(x, (n_pad, feat_pad[0]))

    flat_params = []
    for l, (w, b) in enumerate(params):
        w_p = _pad_to(w, (feat_pad[l], feat_pad[l + 1])).astype(cdt)
        b_p = _pad_to(b.reshape(1, -1), (1, feat_pad[l + 1])).astype(jnp.float32)
        flat_params += [w_p, b_p]

    # --- VMEM budget (conservative: assume double-buffering everywhere). ---
    def bpe(d):
        return jnp.dtype(d).itemsize

    w_bytes = sum(feat_pad[l] * feat_pad[l + 1] * cdt.itemsize
                  for l in range(num_layers))
    b_bytes = sum(feat_pad[l + 1] * 4 for l in range(num_layers))
    io_bytes = (tile_rows * feat_pad[0] * bpe(x.dtype)
                + tile_rows * feat_pad[-1] * bpe(out_dtype))
    act_bytes = tile_rows * max(feat_pad) * 4 * 2
    budget = 2 * (w_bytes + b_bytes + io_bytes) + 2 * act_bytes + (1 << 20)
    if vmem_limit_bytes is None:
        # Clamp to [32 MiB, 64 MiB]: above the scoped defaults (16/32 MiB) and
        # never above v7x's 64 MiB physical per-TC VMEM.
        vmem_limit_bytes = int(min(max(budget, 32 << 20), 64 << 20))

    flops = 2 * n_pad * sum(feat_pad[l] * feat_pad[l + 1]
                            for l in range(num_layers))
    bytes_accessed = (n_pad * feat_pad[0] * bpe(x.dtype) + w_bytes + b_bytes
                      + n_pad * feat_pad[-1] * bpe(out_dtype))
    cost = pl.CostEstimate(flops=flops, transcendentals=0,
                           bytes_accessed=bytes_accessed)

    kernel = _make_mlp_kernel(num_layers, cdt)

    def build_and_run(single_buffer_weights):
        in_specs = [pl.BlockSpec((tile_rows, feat_pad[0]), lambda i: (i, 0))]
        for l in range(num_layers):
            w_shape = (feat_pad[l], feat_pad[l + 1])
            b_shape = (1, feat_pad[l + 1])
            if single_buffer_weights:
                # Resident operands (constant block index): single-buffer to
                # halve their VMEM footprint.
                in_specs.append(pl.BlockSpec(w_shape, lambda i: (0, 0),
                                             pipeline_mode=pl.Buffered(1)))
                in_specs.append(pl.BlockSpec(b_shape, lambda i: (0, 0),
                                             pipeline_mode=pl.Buffered(1)))
            else:
                in_specs.append(pl.BlockSpec(w_shape, lambda i: (0, 0)))
                in_specs.append(pl.BlockSpec(b_shape, lambda i: (0, 0)))
        call = pl.pallas_call(
            kernel,
            out_shape=jax.ShapeDtypeStruct((n_pad, feat_pad[-1]), out_dtype),
            grid_spec=pltpu.PrefetchScalarGridSpec(
                num_scalar_prefetch=0,
                grid=(grid_rows,),
                in_specs=in_specs,
                out_specs=pl.BlockSpec((tile_rows, feat_pad[-1]),
                                       lambda i: (i, 0)),
            ),
            compiler_params=pltpu.CompilerParams(
                dimension_semantics=("parallel",),
                vmem_limit_bytes=vmem_limit_bytes),
            cost_estimate=cost,
        )
        return call(x_p, *flat_params)

    try:
        out_padded = build_and_run(True)
    except Exception:
        # Fallback: default (double-buffered) specs if single-buffering the
        # resident operands is not supported by this jax version.
        out_padded = build_and_run(False)

    # Lane-dense padded slab -> true output shape.
    return out_padded[:n, :out_size]


def init_mlp_params(key, in_size, output_sizes, dtype=jnp.float32):
    """Deterministic synthetic params matching LazyMLP(output_sizes)."""
    params = []
    prev = in_size
    for out in output_sizes:
        key, kw, kb = jax.random.split(key, 3)
        w = jax.random.normal(kw, (prev, out), dtype) * 0.1
        b = jax.random.normal(kb, (1, out), dtype) * 0.1
        params.append((w, b))
        prev = out
    return params


def _reference_forward(x, params):
    h = x
    for l, (w, b) in enumerate(params):
        h = h @ w + b
        if l < len(params) - 1:
            h = jnp.maximum(h, 0.0)
    return h


if __name__ == "__main__":
    key = jax.random.PRNGKey(0)
    k_x, k_p = jax.random.split(key)

    # Small demo shapes: 64 rows, input size 32, LazyMLP([32, 32, 8]).
    num_rows, in_size = 64, 32
    output_sizes = [32, 32, 8]

    x = jax.random.normal(k_x, (num_rows, in_size), jnp.float32)
    params = init_mlp_params(k_p, in_size, output_sizes)

    ref = _reference_forward(x, params)

    # Default path: bf16 MXU feeds, f32 accumulation/epilogue.
    out_bf16 = jax.block_until_ready(lazy_mlp_forward(x, params))
    assert out_bf16.shape == (num_rows, output_sizes[-1])
    assert jnp.allclose(out_bf16.astype(jnp.float32), ref, atol=5e-2, rtol=5e-2)

    # Exact f32 path (tight tolerance).
    out_f32 = jax.block_until_ready(
        lazy_mlp_forward(x, params, compute_dtype=jnp.float32))
    assert out_f32.shape == (num_rows, output_sizes[-1])
    assert jnp.allclose(out_f32, ref, atol=1e-4, rtol=1e-4)

    print("KERNEL_OK")
</pallas_src>

<mosaic_0001>
module attributes {stable_mosaic.version = 11 : i64} {
  func.func @kernel(%arg0: i32, %arg1: memref<64x128xf32, #tpu.memory_space<vmem>>, %arg2: memref<128x128xbf16, #tpu.memory_space<vmem>>, %arg3: memref<1x128xf32, #tpu.memory_space<vmem>>, %arg4: memref<128x128xbf16, #tpu.memory_space<vmem>>, %arg5: memref<1x128xf32, #tpu.memory_space<vmem>>, %arg6: memref<128x128xbf16, #tpu.memory_space<vmem>>, %arg7: memref<1x128xf32, #tpu.memory_space<vmem>>, %arg8: memref<64x128xf32, #tpu.memory_space<vmem>>) attributes {dimension_semantics = [#tpu.dimension_semantics<parallel>], iteration_bounds = array<i64: 1>, scalar_prefetch = 0 : i64, scratch_operands = 0 : i64, tpu.core_type = #tpu.core_type<tc>, window_params = [{transform_indices = @transform_0, window_bounds = array<i64: 64, 128>}, {pipeline_mode = #tpu.pipeline_mode<synchronous>, transform_indices = @transform_1, window_bounds = array<i64: 128, 128>}, {pipeline_mode = #tpu.pipeline_mode<synchronous>, transform_indices = @transform_2, window_bounds = array<i64: 1, 128>}, {pipeline_mode = #tpu.pipeline_mode<synchronous>, transform_indices = @transform_3, window_bounds = array<i64: 128, 128>}, {pipeline_mode = #tpu.pipeline_mode<synchronous>, transform_indices = @transform_4, window_bounds = array<i64: 1, 128>}, {pipeline_mode = #tpu.pipeline_mode<synchronous>, transform_indices = @transform_5, window_bounds = array<i64: 128, 128>}, {pipeline_mode = #tpu.pipeline_mode<synchronous>, transform_indices = @transform_6, window_bounds = array<i64: 1, 128>}, {transform_indices = @transform_7, window_bounds = array<i64: 64, 128>}]} {
    %c0 = arith.constant 0 : index
    %c0_0 = arith.constant 0 : index
    %0 = vector.load %arg1[%c0, %c0_0] : memref<64x128xf32, #tpu.memory_space<vmem>>, vector<64x128xf32>
    %1 = arith.truncf %0 : vector<64x128xf32> to vector<64x128xbf16>
    %c0_1 = arith.constant 0 : index
    %c0_2 = arith.constant 0 : index
    %2 = vector.load %arg2[%c0_1, %c0_2] : memref<128x128xbf16, #tpu.memory_space<vmem>>, vector<128x128xbf16>
    %c0_3 = arith.constant 0 : index
    %c0_4 = arith.constant 0 : index
    %3 = vector.load %arg3[%c0_3, %c0_4] : memref<1x128xf32, #tpu.memory_space<vmem>>, vector<1x128xf32>
    %cst = arith.constant dense<0.000000e+00> : vector<64x128xf32>
    %4 = tpu.matmul %1, %2, %cst {dimension_numbers = #tpu.dot_dimension_numbers<[1], [0], [0], [1], [0, 0, 1, 1], [], []>} : vector<64x128xbf16>, vector<128x128xbf16>, vector<64x128xf32> -> vector<64x128xf32>
    %5 = vector.broadcast %3 : vector<1x128xf32> to vector<64x128xf32>
    %6 = arith.addf %4, %5 : vector<64x128xf32>
    %cst_5 = arith.constant 0.000000e+00 : f32
    %7 = vector.broadcast %cst_5 : f32 to vector<64x128xf32>
    %8 = arith.maximumf %6, %7 : vector<64x128xf32>
    %9 = arith.truncf %8 : vector<64x128xf32> to vector<64x128xbf16>
    %c0_6 = arith.constant 0 : index
    %c0_7 = arith.constant 0 : index
    %10 = vector.load %arg4[%c0_6, %c0_7] : memref<128x128xbf16, #tpu.memory_space<vmem>>, vector<128x128xbf16>
    %c0_8 = arith.constant 0 : index
    %c0_9 = arith.constant 0 : index
    %11 = vector.load %arg5[%c0_8, %c0_9] : memref<1x128xf32, #tpu.memory_space<vmem>>, vector<1x128xf32>
    %cst_10 = arith.constant dense<0.000000e+00> : vector<64x128xf32>
    %12 = tpu.matmul %9, %10, %cst_10 {dimension_numbers = #tpu.dot_dimension_numbers<[1], [0], [0], [1], [0, 0, 1, 1], [], []>} : vector<64x128xbf16>, vector<128x128xbf16>, vector<64x128xf32> -> vector<64x128xf32>
    %13 = vector.broadcast %11 : vector<1x128xf32> to vector<64x128xf32>
    %14 = arith.addf %12, %13 : vector<64x128xf32>
    %cst_11 = arith.constant 0.000000e+00 : f32
    %15 = vector.broadcast %cst_11 : f32 to vector<64x128xf32>
    %16 = arith.maximumf %14, %15 : vector<64x128xf32>
    %17 = arith.truncf %16 : vector<64x128xf32> to vector<64x128xbf16>
    %c0_12 = arith.constant 0 : index
    %c0_13 = arith.constant 0 : index
    %18 = vector.load %arg6[%c0_12, %c0_13] : memref<128x128xbf16, #tpu.memory_space<vmem>>, vector<128x128xbf16>
    %c0_14 = arith.constant 0 : index
    %c0_15 = arith.constant 0 : index
    %19 = vector.load %arg7[%c0_14, %c0_15] : memref<1x128xf32, #tpu.memory_space<vmem>>, vector<1x128xf32>
    %cst_16 = arith.constant dense<0.000000e+00> : vector<64x128xf32>
    %20 = tpu.matmul %17, %18, %cst_16 {dimension_numbers = #tpu.dot_dimension_numbers<[1], [0], [0], [1], [0, 0, 1, 1], [], []>} : vector<64x128xbf16>, vector<128x128xbf16>, vector<64x128xf32> -> vector<64x128xf32>
    %21 = vector.broadcast %19 : vector<1x128xf32> to vector<64x128xf32>
    %22 = arith.addf %20, %21 : vector<64x128xf32>
    %c0_17 = arith.constant 0 : index
    %c0_18 = arith.constant 0 : index
    %23 = vector.load %arg8[%c0_17, %c0_18] : memref<64x128xf32, #tpu.memory_space<vmem>>, vector<64x128xf32>
    tpu.vector_store %arg8[%c0_17, %c0_18], %22 {strides = array<i32>} : memref<64x128xf32, #tpu.memory_space<vmem>>, vector<64x128xf32>,
    return
  }
  func.func @transform_0(%arg0: i32) -> (i32, i32) {
    %c0_i32 = arith.constant 0 : i32
    %c0_i32_0 = arith.constant 0 : i32
    return %arg0, %c0_i32 : i32, i32
  }
  func.func @transform_1(%arg0: i32) -> (i32, i32) {
    %c0_i32 = arith.constant 0 : i32
    %c0_i32_0 = arith.constant 0 : i32
    %c0_i32_1 = arith.constant 0 : i32
    return %c0_i32, %c0_i32_0 : i32, i32
  }
  func.func @transform_2(%arg0: i32) -> (i32, i32) {
    %c0_i32 = arith.constant 0 : i32
    %c0_i32_0 = arith.constant 0 : i32
    %c0_i32_1 = arith.constant 0 : i32
    return %c0_i32, %c0_i32_0 : i32, i32
  }
  func.func @transform_3(%arg0: i32) -> (i32, i32) {
    %c0_i32 = arith.constant 0 : i32
    %c0_i32_0 = arith.constant 0 : i32
    %c0_i32_1 = arith.constant 0 : i32
    return %c0_i32, %c0_i32_0 : i32, i32
  }
  func.func @transform_4(%arg0: i32) -> (i32, i32) {
    %c0_i32 = arith.constant 0 : i32
    %c0_i32_0 = arith.constant 0 : i32
    %c0_i32_1 = arith.constant 0 : i32
    return %c0_i32, %c0_i32_0 : i32, i32
  }
  func.func @transform_5(%arg0: i32) -> (i32, i32) {
    %c0_i32 = arith.constant 0 : i32
    %c0_i32_0 = arith.constant 0 : i32
    %c0_i32_1 = arith.constant 0 : i32
    return %c0_i32, %c0_i32_0 : i32, i32
  }
  func.func @transform_6(%arg0: i32) -> (i32, i32) {
    %c0_i32 = arith.constant 0 : i32
    %c0_i32_0 = arith.constant 0 : i32
    %c0_i32_1 = arith.constant 0 : i32
    return %c0_i32, %c0_i32_0 : i32, i32
  }
  func.func @transform_7(%arg0: i32) -> (i32, i32) {
    %c0_i32 = arith.constant 0 : i32
    %c0_i32_0 = arith.constant 0 : i32
    return %arg0, %c0_i32 : i32, i32
  }
}

module attributes {stable_mosaic.version = 11 : i64} {
  func.func @kernel(%arg0: i32, %arg1: memref<64x128xf32, #tpu.memory_space<vmem>>, %arg2: memref<128x128xbf16, #tpu.memory_space<vmem>>, %arg3: memref<1x128xf32, #tpu.memory_space<vmem>>, %arg4: memref<128x128xbf16, #tpu.memory_space<vmem>>, %arg5: memref<1x128xf32, #tpu.memory_space<vmem>>, %arg6: memref<128x128xbf16, #tpu.memory_space<vmem>>, %arg7: memref<1x128xf32, #tpu.memory_space<vmem>>, %arg8: memref<64x128xf32, #tpu.memory_space<vmem>>) attributes {dimension_semantics = [#tpu.dimension_semantics<parallel>], iteration_bounds = array<i64: 1>, scalar_prefetch = 0 : i64, scratch_operands = 0 : i64, tpu.core_type = #tpu.core_type<tc>, window_params = [{transform_indices = @transform_0, window_bounds = array<i64: 64, 128>}, {pipeline_mode = #tpu.pipeline_mode<synchronous>, transform_indices = @transform_1, window_bounds = array<i64: 128, 128>}, {pipeline_mode = #tpu.pipeline_mode<synchronous>, transform_indices = @transform_2, window_bounds = array<i64: 1, 128>}, {pipeline_mode = #tpu.pipeline_mode<synchronous>, transform_indices = @transform_3, window_bounds = array<i64: 128, 128>}, {pipeline_mode = #tpu.pipeline_mode<synchronous>, transform_indices = @transform_4, window_bounds = array<i64: 1, 128>}, {pipeline_mode = #tpu.pipeline_mode<synchronous>, transform_indices = @transform_5, window_bounds = array<i64: 128, 128>}, {pipeline_mode = #tpu.pipeline_mode<synchronous>, transform_indices = @transform_6, window_bounds = array<i64: 1, 128>}, {transform_indices = @transform_7, window_bounds = array<i64: 64, 128>}]} {
    %c0 = arith.constant 0 : index
    %c0_0 = arith.constant 0 : index
    %0 = vector.load %arg1[%c0, %c0_0] : memref<64x128xf32, #tpu.memory_space<vmem>>, vector<64x128xf32>
    %1 = arith.truncf %0 : vector<64x128xf32> to vector<64x128xbf16>
    %c0_1 = arith.constant 0 : index
    %c0_2 = arith.constant 0 : index
    %2 = vector.load %arg2[%c0_1, %c0_2] : memref<128x128xbf16, #tpu.memory_space<vmem>>, vector<128x128xbf16>
    %c0_3 = arith.constant 0 : index
    %c0_4 = arith.constant 0 : index
    %3 = vector.load %arg3[%c0_3, %c0_4] : memref<1x128xf32, #tpu.memory_space<vmem>>, vector<1x128xf32>
    %cst = arith.constant dense<0.000000e+00> : vector<64x128xf32>
    %4 = tpu.matmul %1, %2, %cst {dimension_numbers = #tpu.dot_dimension_numbers<[1], [0], [0], [1], [0, 0, 1, 1], [], []>} : vector<64x128xbf16>, vector<128x128xbf16>, vector<64x128xf32> -> vector<64x128xf32>
    %5 = vector.broadcast %3 : vector<1x128xf32> to vector<64x128xf32>
    %6 = arith.addf %4, %5 : vector<64x128xf32>
    %cst_5 = arith.constant 0.000000e+00 : f32
    %7 = vector.broadcast %cst_5 : f32 to vector<64x128xf32>
    %8 = arith.maximumf %6, %7 : vector<64x128xf32>
    %9 = arith.truncf %8 : vector<64x128xf32> to vector<64x128xbf16>
    %c0_6 = arith.constant 0 : index
    %c0_7 = arith.constant 0 : index
    %10 = vector.load %arg4[%c0_6, %c0_7] : memref<128x128xbf16, #tpu.memory_space<vmem>>, vector<128x128xbf16>
    %c0_8 = arith.constant 0 : index
    %c0_9 = arith.constant 0 : index
    %11 = vector.load %arg5[%c0_8, %c0_9] : memref<1x128xf32, #tpu.memory_space<vmem>>, vector<1x128xf32>
    %cst_10 = arith.constant dense<0.000000e+00> : vector<64x128xf32>
    %12 = tpu.matmul %9, %10, %cst_10 {dimension_numbers = #tpu.dot_dimension_numbers<[1], [0], [0], [1], [0, 0, 1, 1], [], []>} : vector<64x128xbf16>, vector<128x128xbf16>, vector<64x128xf32> -> vector<64x128xf32>
    %13 = vector.broadcast %11 : vector<1x128xf32> to vector<64x128xf32>
    %14 = arith.addf %12, %13 : vector<64x128xf32>
    %cst_11 = arith.constant 0.000000e+00 : f32
    %15 = vector.broadcast %cst_11 : f32 to vector<64x128xf32>
    %16 = arith.maximumf %14, %15 : vector<64x128xf32>
    %17 = arith.truncf %16 : vector<64x128xf32> to vector<64x128xbf16>
    %c0_12 = arith.constant 0 : index
    %c0_13 = arith.constant 0 : index
    %18 = vector.load %arg6[%c0_12, %c0_13] : memref<128x128xbf16, #tpu.memory_space<vmem>>, vector<128x128xbf16>
    %c0_14 = arith.constant 0 : index
    %c0_15 = arith.constant 0 : index
    %19 = vector.load %arg7[%c0_14, %c0_15] : memref<1x128xf32, #tpu.memory_space<vmem>>, vector<1x128xf32>
    %cst_16 = arith.constant dense<0.000000e+00> : vector<64x128xf32>
    %20 = tpu.matmul %17, %18, %cst_16 {dimension_numbers = #tpu.dot_dimension_numbers<[1], [0], [0], [1], [0, 0, 1, 1], [], []>} : vector<64x128xbf16>, vector<128x128xbf16>, vector<64x128xf32> -> vector<64x128xf32>
    %21 = vector.broadcast %19 : vector<1x128xf32> to vector<64x128xf32>
    %22 = arith.addf %20, %21 : vector<64x128xf32>
    %c0_17 = arith.constant 0 : index
    %c0_18 = arith.constant 0 : index
    %23 = vector.load %arg8[%c0_17, %c0_18] : memref<64x128xf32, #tpu.memory_space<vmem>>, vector<64x128xf32>
    tpu.vector_store %arg8[%c0_17, %c0_18], %22 {strides = array<i32>} : memref<64x128xf32, #tpu.memory_space<vmem>>, vector<64x128xf32>,
    return
  }
  func.func @transform_0(%arg0: i32) -> (i32, i32) {
    %c0_i32 = arith.constant 0 : i32
    %c0_i32_0 = arith.constant 0 : i32
    return %arg0, %c0_i32 : i32, i32
  }
  func.func @transform_1(%arg0: i32) -> (i32, i32) {
    %c0_i32 = arith.constant 0 : i32
    %c0_i32_0 = arith.constant 0 : i32
    %c0_i32_1 = arith.constant 0 : i32
    return %c0_i32, %c0_i32_0 : i32, i32
  }
  func.func @transform_2(%arg0: i32) -> (i32, i32) {
    %c0_i32 = arith.constant 0 : i32
    %c0_i32_0 = arith.constant 0 : i32
    %c0_i32_1 = arith.constant 0 : i32
    return %c0_i32, %c0_i32_0 : i32, i32
  }
  func.func @transform_3(%arg0: i32) -> (i32, i32) {
    %c0_i32 = arith.constant 0 : i32
    %c0_i32_0 = arith.constant 0 : i32
    %c0_i32_1 = arith.constant 0 : i32
    return %c0_i32, %c0_i32_0 : i32, i32
  }
  func.func @transform_4(%arg0: i32) -> (i32, i32) {
    %c0_i32 = arith.constant 0 : i32
    %c0_i32_0 = arith.constant 0 : i32
    %c0_i32_1 = arith.constant 0 : i32
    return %c0_i32, %c0_i32_0 : i32, i32
  }
  func.func @transform_5(%arg0: i32) -> (i32, i32) {
    %c0_i32 = arith.constant 0 : i32
    %c0_i32_0 = arith.constant 0 : i32
    %c0_i32_1 = arith.constant 0 : i32
    return %c0_i32, %c0_i32_0 : i32, i32
  }
  func.func @transform_6(%arg0: i32) -> (i32, i32) {
    %c0_i32 = arith.constant 0 : i32
    %c0_i32_0 = arith.constant 0 : i32
    %c0_i32_1 = arith.constant 0 : i32
    return %c0_i32, %c0_i32_0 : i32, i32
  }
  func.func @transform_7(%arg0: i32) -> (i32, i32) {
    %c0_i32 = arith.constant 0 : i32
    %c0_i32_0 = arith.constant 0 : i32
    return %arg0, %c0_i32 : i32, i32
  }
}

</mosaic_0001>

<bundles_post_ra>
// kernel: tpu_custom_call.1
= control target key start
LH: loop header
LB: loop body
LE: loop exit
PB: predicated region body
PF: predicated region fallthrough
CT: control target
= control target key end

     0   :  { %12 = vsyncpa [#allocation3], 0  ;;  %s934_s0 = inlined_call_operand.hbm [shape: f32[64,128], index: 0, kind: input, shape index: {}]   ;;  %s935_s1 = inlined_call_operand.hbm [shape: bf16[128,128], index: 1, kind: input, shape index: {}]   ;;  %s936_s2 = inlined_call_operand.vmem [shape: f32[1,128], index: 2, kind: input, shape index: {}]   ;;  %s937_s3 = inlined_call_operand.hbm [shape: bf16[128,128], index: 3, kind: input, shape index: {}]   ;;  %s938_s4 = inlined_call_operand.vmem [shape: f32[1,128], index: 4, kind: input, shape index: {}]   ;;  %s939_s5 = inlined_call_operand.hbm [shape: bf16[128,128], index: 5, kind: input, shape index: {}]   ;;  %s940_s6 = inlined_call_operand.vmem [shape: f32[1,128], index: 6, kind: input, shape index: {}]   ;;  %s941_s7 = inlined_call_operand.hbm [shape: f32[64,128], index: 7, kind: output, shape index: {}]  }
   0x1   :  { %13 = vsyncpa [#allocation6], 0 }
   0x2   :  { %14 = vsyncpa [#allocation9], 0 }
   0x3   :  { %15 = vsyncpa [#allocation4], 0  ;;  %s846_s24 = smov [#allocation5]  }
   0x4   :  { %s33_s25 = sshll.u32 %s846_s24, 4  ;;  %s34_s25 = int_to_ptr.vmem [resolvable:$true] %s33_s25 }
   0x5   :  { %s746_s26 = scalar_lea.vmem %s34_s25, 1024  ;;  %p751_p1 = scmp.lt.s32.totalorder %s34_s25, %s34_s25 }
   0x6   :  { %p747_p0 = scmp.ne.s32.totalorder %s34_s25, %s746_s26  ;;  %p752_p2 = scmp.lt.s32.totalorder %s746_s26, %s746_s26 }
   0x8   :  { %p753_p3 = por %p752_p2, %p751_p1 }
   0xa   :  { %p754_p4 = pnand %p753_p3, %p747_p0 }
   0xc   :  { %757 = shalt.err (!%p754_p4)
}
   0xd   :  { %s847_s27 = smov 64   ;;  %s848_s28 = smov 4  }
   0xe   :  { %39 = dma.hbm_to_vmem [thread:$0]  %s935_s1, 1024, %s34_s25, [#allocation6], %s847_s27, %s847_s27, %s848_s28  }
   0xf   :  { %s849_s8 = smov [#allocation2]  }
  0x10   :  { %s21_s9 = sshll.u32 %s849_s8, 4  ;;  %s22_s9 = int_to_ptr.vmem [resolvable:$true] %s21_s9 }
  0x11   :  { %s766_s10 = scalar_lea.vmem %s22_s9, 1024  ;;  %p771_p6 = scmp.lt.s32.totalorder %s22_s9, %s22_s9 }
  0x12   :  { %p767_p5 = scmp.ne.s32.totalorder %s22_s9, %s766_s10  ;;  %p772_p7 = scmp.lt.s32.totalorder %s766_s10, %s766_s10 }
  0x14   :  { %p773_p8 = por %p772_p7, %p771_p6 }
  0x16   :  { %p774_p9 = pnand %p773_p8, %p767_p5 }
  0x18   :  { %777 = shalt.err (!%p774_p9)
}
  0x19   :  { %s850_s11 = smov 128   ;;  %s851_s12 = smov 8  }
  0x1a   :  { %27 = dma.hbm_to_vmem [thread:$0]  %s934_s0, 1024, %s22_s9, [#allocation3], %s850_s11, %s850_s11, %s851_s12  }
  0x1b   :  { %s852_s1 = smov [#allocation7]   ;;  %s853_s16 = smov [#allocation8]  }
  0x1c   :  { %s47_s15 = sshll.u32 %s852_s1, 4  ;;  %s61_s17 = sshll.u32 %s853_s16, 4  ;;  %s48_s15 = int_to_ptr.vmem [resolvable:$true] %s47_s15  ;;  %s62_s17 = int_to_ptr.vmem [resolvable:$true] %s61_s17 }
  0x1d   :  { %s786_s18 = scalar_lea.vmem %s48_s15, 1024  ;;  %p791_p11 = scmp.lt.s32.totalorder %s48_s15, %s48_s15 }
  0x1e   :  { %p787_p10 = scmp.ne.s32.totalorder %s48_s15, %s786_s18  ;;  %p792_p12 = scmp.lt.s32.totalorder %s786_s18, %s786_s18 }
  0x20   :  { %p793_p13 = por %p792_p12, %p791_p11 }
  0x22   :  { %p794_p0 = pnand %p793_p13, %p787_p10 }
  0x24   :  { %797 = shalt.err (!%p794_p0)
}
  0x25   :  { %53 = dma.hbm_to_vmem [thread:$0]  %s937_s3, 1024, %s48_s15, [#allocation6], %s847_s27, %s847_s27, %s848_s28  }
  0x26   :  { %s806_s0 = scalar_lea.vmem %s62_s17, 1024  ;;  %p811_p2 = scmp.lt.s32.totalorder %s62_s17, %s62_s17 }
  0x27   :  { %p807_p1 = scmp.ne.s32.totalorder %s62_s17, %s806_s0  ;;  %p812_p3 = scmp.lt.s32.totalorder %s806_s0, %s806_s0 }
  0x29   :  { %p813_p4 = por %p812_p3, %p811_p2 }
  0x2b   :  { %p814_p5 = pnand %p813_p4, %p807_p1 }
  0x2d   :  { %817 = shalt.err (!%p814_p5)
}
  0x2e   :  { %67 = dma.hbm_to_vmem [thread:$0]  %s939_s5, 1024, %s62_s17, [#allocation9], %s847_s27, %s847_s27, %s848_s28  }
  0x2f   :  { %838 = dma.done.wait [#allocation3], 1024  }
  0x30   :  { %839 = vsyncadd [#allocation3], 4294966272 }
  0x31   :  { %840 = dma.done.wait [#allocation6], 2048  }
  0x32   :  { %841 = vsyncadd [#allocation6], 4294965248 }
  0x33   :  { %842 = dma.done.wait [#allocation9], 1024  }
  0x34   :  { %843 = vsyncadd [#allocation9], 4294966272  ;;  %v714_v0 = vld [vmem:[#allocation5 + $0x38] sm:$0xff]   ;;  %v715_v1 = vld [vmem:[#allocation5 + $0x30] sm:$0xff]   ;;  %s854_s25 = smov [#allocation10]  }
  0x35   :  { %617 = vmatprep.subr.bf16.mxu0 %v714_v0  ;;  %v716_v2 = vld [vmem:[#allocation5 + $0x28] sm:$0xff]   ;;  %v717_v3 = vld [vmem:[#allocation5 + $0x20] sm:$0xff]   ;;  %v718_v7 = vld [vmem:[#allocation5 + $0x18] sm:$0xff]  }
  0x36   :  { %618 = vmatpush3.bf16.msra.mxu0 %v714_v0  ;;  %v83_v4 = vld [vmem:[#allocation2] sm:$0xff]  ;;  %v84_v5 = vld [vmem:[#allocation2 + $0x8] sm:$0xff]  ;;  %v722_v8 = vld [vmem:[#allocation7 + $0x38] sm:$0xff]  }
  0x37   :  { %619 = vmatprep.subr.bf16.mxu0 %v715_v1  ;;  %v91_v6 = vpack.c.bf16 %v84_v5, %v83_v4  ;;  %v723_v9 = vld [vmem:[#allocation7 + $0x30] sm:$0xff]   ;;  %641 = vmatprep.subr.bf16.mxu1 %v722_v8  ;;  %v724_v11 = vld [vmem:[#allocation7 + $0x28] sm:$0xff]   ;;  %v725_v12 = vld [vmem:[#allocation7 + $0x20] sm:$0xff]  }
  0x38   :  { %v719_v10 = vld [vmem:[#allocation5 + $0x10] sm:$0xff]   ;;  %642 = vmatpush3.bf16.msra.mxu1 %v722_v8  ;;  %v720_v13 = vld [vmem:[#allocation5 + $0x8] sm:$0xff]   ;;  %v726_v14 = vld [vmem:[#allocation7 + $0x18] sm:$0xff]  }
  0x39   :  { %633 = vmatprep.mubr.bf16.mxu0 %v91_v6  ;;  %643 = vmatprep.subr.bf16.mxu1 %v723_v9  ;;  %v721_v15 = vld [vmem:[#allocation5] sm:$0xff]   ;;  %v85_v16 = vld [vmem:[#allocation2 + $0x10] sm:$0xff]  ;;  %v86_v17 = vld [vmem:[#allocation2 + $0x18] sm:$0xff] }
  0x3a   :  { %620 = vmatpush3.bf16.msra.mxu0 %v715_v1  ;;  %v87_v18 = vld [vmem:[#allocation2 + $0x20] sm:$0xff]  ;;  %v88_v19 = vld [vmem:[#allocation2 + $0x28] sm:$0xff]  ;;  %v92_v20 = vpack.c.bf16 %v86_v17, %v85_v16  ;;  %v89_v22 = vld [vmem:[#allocation2 + $0x30] sm:$0xff] }
  0x3b   :  { %621 = vmatprep.subr.bf16.mxu0 %v716_v2  ;;  %v93_v21 = vpack.c.bf16 %v88_v19, %v87_v18  ;;  %v90_v23 = vld [vmem:[#allocation2 + $0x38] sm:$0xff]  ;;  %v727_v25 = vld [vmem:[#allocation7 + $0x10] sm:$0xff]   ;;  %v728_v26 = vld [vmem:[#allocation7 + $0x8] sm:$0xff]  }
  0x3c   :  { %644 = vmatpush3.bf16.msra.mxu1 %v723_v9  ;;  %v94_v24 = vpack.c.bf16 %v90_v23, %v89_v22  ;;  %v729_v27 = vld [vmem:[#allocation7] sm:$0xff]   ;;  %v730_v28 = vld [vmem:[#allocation8 + $0x38] sm:$0xff]   ;;  %v731_v29 = vld [vmem:[#allocation8 + $0x30] sm:$0xff]  }
  0x3d   :  { %645 = vmatprep.subr.bf16.mxu1 %v724_v11  ;;  %v732_v30 = vld [vmem:[#allocation8 + $0x28] sm:$0xff]   ;;  %v733_v31 = vld [vmem:[#allocation8 + $0x20] sm:$0xff]   ;;  %v734_v32 = vld [vmem:[#allocation8 + $0x18] sm:$0xff]  }
  0x3e   :  { %622 = vmatpush3.bf16.msra.mxu0 %v716_v2  ;;  %v554_v35 = vld [vmem:[%s936_s2] ss:$0 sm:$0xff]  ;;  %v735_v62 = vld [vmem:[#allocation8 + $0x10] sm:$0xff]   ;;  %v736_v63 = vld [vmem:[#allocation8 + $0x8] sm:$0xff]  }
  0x3f   :  { %623 = vmatprep.subr.bf16.mxu0 %v717_v3  ;;  %v737_v0 = vld [vmem:[#allocation8] sm:$0xff]  }
  0x40   :  { %646 = vmatpush3.bf16.msra.mxu1 %v724_v11 }
  0x41   :  { %647 = vmatprep.subr.bf16.mxu1 %v725_v12 }
  0x42   :  { %624 = vmatpush3.bf16.msra.mxu0 %v717_v3  ;;  %v563_v3 = vld [vmem:[%s938_s4] ss:$0 sm:$0xff] }
  0x43   :  { %625 = vmatprep.subr.bf16.mxu0 %v718_v7 }
  0x44   :  { %648 = vmatpush3.bf16.msra.mxu1 %v725_v12 }
  0x45   :  { %649 = vmatprep.subr.bf16.mxu1 %v726_v14 }
  0x46   :  { %626 = vmatpush3.bf16.msra.mxu0 %v718_v7 }
  0x47   :  { %627 = vmatprep.subr.bf16.mxu0 %v719_v10 }
  0x48   :  { %650 = vmatpush3.bf16.msra.mxu1 %v726_v14 }
  0x49   :  { %651 = vmatprep.subr.bf16.mxu1 %v727_v25 }
  0x4a   :  { %628 = vmatpush3.bf16.msra.mxu0 %v719_v10 }
  0x4b   :  { %629 = vmatprep.subr.bf16.mxu0 %v720_v13 }
  0x4c   :  { %652 = vmatpush3.bf16.msra.mxu1 %v727_v25 }
  0x4d   :  { %653 = vmatprep.subr.bf16.mxu1 %v728_v26 }
  0x4e   :  { %630 = vmatpush3.bf16.msra.mxu0 %v720_v13 }
  0x4f   :  { %631 = vmatprep.subr.bf16.mxu0 %v721_v15 }
  0x50   :  { %654 = vmatpush3.bf16.msra.mxu1 %v728_v26 }
  0x51   :  { %655 = vmatprep.subr.bf16.mxu1 %v729_v27 }
  0x52   :  { %632 = vmatpush3.bf16.msra.mxu0 %v721_v15 }
  0x53   :  { %665 = vmatprep.subr.bf16.mxu0 %v730_v28 }
  0x54   :  { %656 = vmatpush3.bf16.msra.mxu1 %v729_v27 }
  0x55   :  { %634 = vmatmul.mubr.bf16.vlgmr.msra.gmra.mxu0 %v92_v20  ;;  %689 = vmatprep.subr.bf16.mxu1 %v730_v28 }
  0x56   :  { %637 = vmatprep.mubr.bf16.mxu0 %v93_v21  ;;  %666 = vmatpush3.bf16.msra.mxu0 %v730_v28 }
  0x57   :  { %667 = vmatprep.subr.bf16.mxu0 %v731_v29 }
  0x5a   :  { %668 = vmatpush3.bf16.msra.mxu0 %v731_v29 }
  0x5b   :  { %669 = vmatprep.subr.bf16.mxu0 %v732_v30 }
  0x5d   :  { %638 = vmatmul.mubr.bf16.gmra.mxu0 %v94_v24 }
  0x5e   :  { %670 = vmatpush3.bf16.msra.mxu0 %v732_v30 }
  0x5f   :  { %671 = vmatprep.subr.bf16.mxu0 %v733_v31 }
  0x62   :  { %672 = vmatpush3.bf16.msra.mxu0 %v733_v31 }
  0x63   :  { %673 = vmatprep.subr.bf16.mxu0 %v734_v32 }
  0x66   :  { %674 = vmatpush3.bf16.msra.mxu0 %v734_v32 }
  0x67   :  { %675 = vmatprep.subr.bf16.mxu0 %v735_v62 }
  0x6a   :  { %676 = vmatpush3.bf16.msra.mxu0 %v735_v62 }
  0x6b   :  { %677 = vmatprep.subr.bf16.mxu0 %v736_v63 }
  0x6e   :  { %678 = vmatpush3.bf16.msra.mxu0 %v736_v63 }
  0x6f   :  { %679 = vmatprep.subr.bf16.mxu0 %v737_v0 }
  0x72   :  { %680 = vmatpush3.bf16.msra.mxu0 %v737_v0 }
 0x115   :  { %v635_v33 = vpop.f32.mrf.mxu0 }
 0x116   :  { %v209_v39 = vadd.f32 %v635_v33, %v554_v35 }
 0x117   :  { %v200_v34 = vpop.f32.mrf.mxu0 }
 0x118   :  { %v201_v37 = vadd.f32 %v554_v35, %v200_v34  ;;  %v233_v46 = vmax.f32 %v209_v39, 0.0 }
 0x119   :  { %v636_v36 = vpop.f32.mrf.mxu0 }
 0x11a   :  { %v212_v38 = vadd.f32 %v636_v36, %v554_v35  ;;  %v231_v44 = vmax.f32 %v201_v37, 0.0 }
 0x11b   :  { %v203_v40 = vpop.f32.mrf.mxu0 }
 0x11c   :  { %v204_v41 = vadd.f32 %v554_v35, %v203_v40  ;;  %v234_v42 = vmax.f32 %v212_v38, 0.0 }
 0x11d   :  { %v639_v43 = vpop.f32.mrf.mxu0 }
 0x11e   :  { %v232_v45 = vmax.f32 %v204_v41, 0.0  ;;  %v240_v49 = vpack.c.bf16 %v234_v42, %v233_v46  ;;  %v225_v53 = vadd.f32 %v639_v43, %v554_v35 }
 0x11f   :  { %v216_v47 = vpop.f32.mrf.mxu0 }
 0x120   :  { %v239_v48 = vpack.c.bf16 %v232_v45, %v231_v44  ;;  %v217_v51 = vadd.f32 %v554_v35, %v216_v47  ;;  %v237_v59 = vmax.f32 %v225_v53, 0.0 }
 0x121   :  { %v640_v50 = vpop.f32.mrf.mxu0 }
 0x122   :  { %v228_v52 = vadd.f32 %v640_v50, %v554_v35  ;;  %657 = vmatprep.mubr.bf16.mxu1 %v239_v48  ;;  %v235_v57 = vmax.f32 %v217_v51, 0.0 }
 0x123   :  { %v219_v54 = vpop.f32.mrf.mxu0  ;;  %658 = vmatmul.mubr.bf16.vlgmr.msra.gmra.mxu1 %v240_v49 }
 0x124   :  { %v220_v55 = vadd.f32 %v554_v35, %v219_v54  ;;  %697 = vmatpush3.bf16.msra.mxu1 %v730_v28  ;;  %v238_v56 = vmax.f32 %v228_v52, 0.0 }
 0x125   :  { %690 = vmatprep.subr.bf16.mxu1 %v731_v29 }
 0x126   :  { %v236_v58 = vmax.f32 %v220_v55, 0.0  ;;  %v242_v61 = vpack.c.bf16 %v238_v56, %v237_v59 }
 0x128   :  { %v241_v60 = vpack.c.bf16 %v236_v58, %v235_v57  ;;  %698 = vmatpush3.bf16.msra.mxu1 %v731_v29 }
 0x129   :  { %691 = vmatprep.subr.bf16.mxu1 %v732_v30 }
 0x12a   :  { %661 = vmatprep.mubr.bf16.mxu1 %v241_v60 }
 0x12b   :  { %662 = vmatmul.mubr.bf16.gmra.mxu1 %v242_v61 }
 0x12c   :  { %699 = vmatpush3.bf16.msra.mxu1 %v732_v30  ;;  %v572_v30 = vld [vmem:[%s940_s6] ss:$0 sm:$0xff]  ;;  %s540_s6 = sshll.u32 %s854_s25, 4  ;;  %s541_s6 = int_to_ptr.vmem [resolvable:$true] %s540_s6 }
 0x12d   :  { %692 = vmatprep.subr.bf16.mxu1 %v733_v31  ;;  %s818_s26 = scalar_lea.vmem %s541_s6, 1024  ;;  %p823_p7 = scmp.lt.s32.totalorder %s541_s6, %s541_s6 }
 0x12e   :  { %p819_p6 = scmp.ne.s32.totalorder %s541_s6, %s818_s26  ;;  %p824_p8 = scmp.lt.s32.totalorder %s818_s26, %s818_s26 }
 0x130   :  { %700 = vmatpush3.bf16.msra.mxu1 %v733_v31  ;;  %p825_p9 = por %p824_p8, %p823_p7 }
 0x131   :  { %693 = vmatprep.subr.bf16.mxu1 %v734_v32 }
 0x132   :  { %p826_p10 = pnand %p825_p9, %p819_p6 }
 0x134   :  { %701 = vmatpush3.bf16.msra.mxu1 %v734_v32 }
 0x135   :  { %694 = vmatprep.subr.bf16.mxu1 %v735_v62 }
 0x138   :  { %702 = vmatpush3.bf16.msra.mxu1 %v735_v62 }
 0x139   :  { %695 = vmatprep.subr.bf16.mxu1 %v736_v63 }
 0x13c   :  { %703 = vmatpush3.bf16.msra.mxu1 %v736_v63 }
 0x13d   :  { %696 = vmatprep.subr.bf16.mxu1 %v737_v0 }
 0x140   :  { %704 = vmatpush3.bf16.msra.mxu1 %v737_v0 }
 0x1e3   :  { %v659_v1 = vpop.f32.mrf.mxu1 }
 0x1e4   :  { %v357_v7 = vadd.f32 %v659_v1, %v563_v3 }
 0x1e5   :  { %v348_v2 = vpop.f32.mrf.mxu1 }
 0x1e6   :  { %v349_v5 = vadd.f32 %v563_v3, %v348_v2  ;;  %v381_v14 = vmax.f32 %v357_v7, 0.0 }
 0x1e7   :  { %v660_v4 = vpop.f32.mrf.mxu1 }
 0x1e8   :  { %v360_v6 = vadd.f32 %v660_v4, %v563_v3  ;;  %v379_v12 = vmax.f32 %v349_v5, 0.0 }
 0x1e9   :  { %v351_v8 = vpop.f32.mrf.mxu1 }
 0x1ea   :  { %v352_v9 = vadd.f32 %v563_v3, %v351_v8  ;;  %v382_v10 = vmax.f32 %v360_v6, 0.0 }
 0x1eb   :  { %v663_v11 = vpop.f32.mrf.mxu1 }
 0x1ec   :  { %v380_v13 = vmax.f32 %v352_v9, 0.0  ;;  %v388_v17 = vpack.c.bf16 %v382_v10, %v381_v14  ;;  %v373_v21 = vadd.f32 %v663_v11, %v563_v3 }
 0x1ed   :  { %v364_v15 = vpop.f32.mrf.mxu1 }
 0x1ee   :  { %v387_v16 = vpack.c.bf16 %v380_v13, %v379_v12  ;;  %v365_v19 = vadd.f32 %v563_v3, %v364_v15  ;;  %v385_v27 = vmax.f32 %v373_v21, 0.0 }
 0x1ef   :  { %v664_v18 = vpop.f32.mrf.mxu1 }
 0x1f0   :  { %v376_v20 = vadd.f32 %v664_v18, %v563_v3  ;;  %681 = vmatprep.mubr.bf16.mxu0 %v387_v16  ;;  %v383_v25 = vmax.f32 %v365_v19, 0.0 }
 0x1f1   :  { %v367_v22 = vpop.f32.mrf.mxu1  ;;  %682 = vmatmul.mubr.bf16.vlgmr.msra.gmra.mxu0 %v388_v17 }
 0x1f2   :  { %v368_v23 = vadd.f32 %v563_v3, %v367_v22  ;;  %v386_v24 = vmax.f32 %v376_v20, 0.0 }
 0x1f4   :  { %v384_v26 = vmax.f32 %v368_v23, 0.0  ;;  %v390_v29 = vpack.c.bf16 %v386_v24, %v385_v27 }
 0x1f6   :  { %v389_v28 = vpack.c.bf16 %v384_v26, %v383_v25 }
 0x1f8   :  { %685 = vmatprep.mubr.bf16.mxu1 %v389_v28 }
 0x1f9   :  { %686 = vmatmul.mubr.bf16.vlgmr.msra.gmra.mxu1 %v390_v29 }
 0x2b1   :  { %v683_v31 = vpop.f32.mrf.mxu0 }
 0x2b2   :  { %v505_v32 = vadd.f32 %v683_v31, %v572_v30 }
 0x2b3   :  { %v496_v33 = vpop.f32.mrf.mxu0 }
 0x2b4   :  { %529 = vst [vmem:[#allocation10 + $0x10] sm:$0xff] %v505_v32  ;;  %v497_v34 = vadd.f32 %v572_v30, %v496_v33 }
 0x2b5   :  { %v684_v35 = vpop.f32.mrf.mxu0 }
 0x2b6   :  { %527 = vst [vmem:[#allocation10] sm:$0xff] %v497_v34  ;;  %v508_v36 = vadd.f32 %v684_v35, %v572_v30 }
 0x2b7   :  { %v499_v37 = vpop.f32.mrf.mxu0 }
 0x2b8   :  { %530 = vst [vmem:[#allocation10 + $0x18] sm:$0xff] %v508_v36  ;;  %v500_v38 = vadd.f32 %v572_v30, %v499_v37 }
 0x2b9   :  { %v687_v39 = vpop.f32.mrf.mxu1 }
 0x2ba   :  { %528 = vst [vmem:[#allocation10 + $0x8] sm:$0xff] %v500_v38  ;;  %v521_v40 = vadd.f32 %v687_v39, %v572_v30 }
 0x2bb   :  { %v512_v41 = vpop.f32.mrf.mxu1 }
 0x2bc   :  { %533 = vst [vmem:[#allocation10 + $0x30] sm:$0xff] %v521_v40  ;;  %v513_v42 = vadd.f32 %v572_v30, %v512_v41 }
 0x2bd   :  { %v688_v43 = vpop.f32.mrf.mxu1 }
 0x2be   :  { %531 = vst [vmem:[#allocation10 + $0x20] sm:$0xff] %v513_v42  ;;  %v524_v44 = vadd.f32 %v688_v43, %v572_v30 }
 0x2bf   :  { %v515_v45 = vpop.f32.mrf.mxu1 }
 0x2c0   :  { %534 = vst [vmem:[#allocation10 + $0x38] sm:$0xff] %v524_v44  ;;  %v516_v46 = vadd.f32 %v572_v30, %v515_v45 }
 0x2c2   :  { %532 = vst [vmem:[#allocation10 + $0x28] sm:$0xff] %v516_v46 }
 0x2c3   :  { %829 = shalt.err (!%p826_p10)
}
 0x2c4   :  { %546 = dma.vmem_to_hbm [thread:$0]  %s541_s6, 1024, %s941_s7, [#allocation4], %s850_s11, %s850_s11, %s851_s12  }
 0x2c5   :  { %844 = dma.done.wait [#allocation4], 1024  }
 0x2c6   :  { %845 = vsyncadd [#allocation4], 4294966272 }
 0x2c7   :  { %550 = vsyncpa [#allocation3], 1 }
 0x2c8   :  { %551 = vsyncpa [#allocation6], 1 }
 0x2c9   :  { %552 = vsyncpa [#allocation9], 1 }
 0x2ca   :  { %553 = vsyncpa [#allocation4], 1 }

// kernel: tpu_custom_call.1
= control target key start
LH: loop header
LB: loop body
LE: loop exit
PB: predicated region body
PF: predicated region fallthrough
CT: control target
= control target key end

     0   :  { %12 = vsyncpa [#allocation3], 0  ;;  %s934_s0 = inlined_call_operand.hbm [shape: f32[64,128], index: 0, kind: input, shape index: {}]   ;;  %s935_s1 = inlined_call_operand.hbm [shape: bf16[128,128], index: 1, kind: input, shape index: {}]   ;;  %s936_s2 = inlined_call_operand.vmem [shape: f32[1,128], index: 2, kind: input, shape index: {}]   ;;  %s937_s3 = inlined_call_operand.hbm [shape: bf16[128,128], index: 3, kind: input, shape index: {}]   ;;  %s938_s4 = inlined_call_operand.vmem [shape: f32[1,128], index: 4, kind: input, shape index: {}]   ;;  %s939_s5 = inlined_call_operand.hbm [shape: bf16[128,128], index: 5, kind: input, shape index: {}]   ;;  %s940_s6 = inlined_call_operand.vmem [shape: f32[1,128], index: 6, kind: input, shape index: {}]   ;;  %s941_s7 = inlined_call_operand.hbm [shape: f32[64,128], index: 7, kind: output, shape index: {}]  }
   0x1   :  { %13 = vsyncpa [#allocation6], 0 }
   0x2   :  { %14 = vsyncpa [#allocation9], 0 }
   0x3   :  { %15 = vsyncpa [#allocation4], 0  ;;  %s846_s24 = smov [#allocation5]  }
   0x4   :  { %s33_s25 = sshll.u32 %s846_s24, 4  ;;  %s34_s25 = int_to_ptr.vmem [resolvable:$true] %s33_s25 }
   0x5   :  { %s746_s26 = scalar_lea.vmem %s34_s25, 1024  ;;  %p751_p1 = scmp.lt.s32.totalorder %s34_s25, %s34_s25 }
   0x6   :  { %p747_p0 = scmp.ne.s32.totalorder %s34_s25, %s746_s26  ;;  %p752_p2 = scmp.lt.s32.totalorder %s746_s26, %s746_s26 }
   0x8   :  { %p753_p3 = por %p752_p2, %p751_p1 }
   0xa   :  { %p754_p4 = pnand %p753_p3, %p747_p0 }
   0xc   :  { %757 = shalt.err (!%p754_p4)
}
   0xd   :  { %s847_s27 = smov 64   ;;  %s848_s28 = smov 4  }
   0xe   :  { %39 = dma.hbm_to_vmem [thread:$0]  %s935_s1, 1024, %s34_s25, [#allocation6], %s847_s27, %s847_s27, %s848_s28  }
   0xf   :  { %s849_s8 = smov [#allocation2]  }
  0x10   :  { %s21_s9 = sshll.u32 %s849_s8, 4  ;;  %s22_s9 = int_to_ptr.vmem [resolvable:$true] %s21_s9 }
  0x11   :  { %s766_s10 = scalar_lea.vmem %s22_s9, 1024  ;;  %p771_p6 = scmp.lt.s32.totalorder %s22_s9, %s22_s9 }
  0x12   :  { %p767_p5 = scmp.ne.s32.totalorder %s22_s9, %s766_s10  ;;  %p772_p7 = scmp.lt.s32.totalorder %s766_s10, %s766_s10 }
  0x14   :  { %p773_p8 = por %p772_p7, %p771_p6 }
  0x16   :  { %p774_p9 = pnand %p773_p8, %p767_p5 }
  0x18   :  { %777 = shalt.err (!%p774_p9)
}
  0x19   :  { %s850_s11 = smov 128   ;;  %s851_s12 = smov 8  }
  0x1a   :  { %27 = dma.hbm_to_vmem [thread:$0]  %s934_s0, 1024, %s22_s9, [#allocation3], %s850_s11, %s850_s11, %s851_s12  }
  0x1b   :  { %s852_s1 = smov [#allocation7]   ;;  %s853_s16 = smov [#allocation8]  }
  0x1c   :  { %s47_s15 = sshll.u32 %s852_s1, 4  ;;  %s61_s17 = sshll.u32 %s853_s16, 4  ;;  %s48_s15 = int_to_ptr.vmem [resolvable:$true] %s47_s15  ;;  %s62_s17 = int_to_ptr.vmem [resolvable:$true] %s61_s17 }
  0x1d   :  { %s786_s18 = scalar_lea.vmem %s48_s15, 1024  ;;  %p791_p11 = scmp.lt.s32.totalorder %s48_s15, %s48_s15 }
  0x1e   :  { %p787_p10 = scmp.ne.s32.totalorder %s48_s15, %s786_s18  ;;  %p792_p12 = scmp.lt.s32.totalorder %s786_s18, %s786_s18 }
  0x20   :  { %p793_p13 = por %p792_p12, %p791_p11 }
  0x22   :  { %p794_p0 = pnand %p793_p13, %p787_p10 }
  0x24   :  { %797 = shalt.err (!%p794_p0)
}
  0x25   :  { %53 = dma.hbm_to_vmem [thread:$0]  %s937_s3, 1024, %s48_s15, [#allocation6], %s847_s27, %s847_s27, %s848_s28  }
  0x26   :  { %s806_s0 = scalar_lea.vmem %s62_s17, 1024  ;;  %p811_p2 = scmp.lt.s32.totalorder %s62_s17, %s62_s17 }
  0x27   :  { %p807_p1 = scmp.ne.s32.totalorder %s62_s17, %s806_s0  ;;  %p812_p3 = scmp.lt.s32.totalorder %s806_s0, %s806_s0 }
  0x29   :  { %p813_p4 = por %p812_p3, %p811_p2 }
  0x2b   :  { %p814_p5 = pnand %p813_p4, %p807_p1 }
  0x2d   :  { %817 = shalt.err (!%p814_p5)
}
  0x2e   :  { %67 = dma.hbm_to_vmem [thread:$0]  %s939_s5, 1024, %s62_s17, [#allocation9], %s847_s27, %s847_s27, %s848_s28  }
  0x2f   :  { %838 = dma.done.wait [#allocation3], 1024  }
  0x30   :  { %839 = vsyncadd [#allocation3], 4294966272 }
  0x31   :  { %840 = dma.done.wait [#allocation6], 2048  }
  0x32   :  { %841 = vsyncadd [#allocation6], 4294965248 }
  0x33   :  { %842 = dma.done.wait [#allocation9], 1024  }
  0x34   :  { %843 = vsyncadd [#allocation9], 4294966272  ;;  %v714_v0 = vld [vmem:[#allocation5 + $0x38] sm:$0xff]   ;;  %v715_v1 = vld [vmem:[#allocation5 + $0x30] sm:$0xff]   ;;  %s854_s25 = smov [#allocation10]  }
  0x35   :  { %617 = vmatprep.subr.bf16.mxu0 %v714_v0  ;;  %v716_v2 = vld [vmem:[#allocation5 + $0x28] sm:$0xff]   ;;  %v717_v3 = vld [vmem:[#allocation5 + $0x20] sm:$0xff]   ;;  %v718_v7 = vld [vmem:[#allocation5 + $0x18] sm:$0xff]  }
  0x36   :  { %618 = vmatpush3.bf16.msra.mxu0 %v714_v0  ;;  %v83_v4 = vld [vmem:[#allocation2] sm:$0xff]  ;;  %v84_v5 = vld [vmem:[#allocation2 + $0x8] sm:$0xff]  ;;  %v722_v8 = vld [vmem:[#allocation7 + $0x38] sm:$0xff]  }
  0x37   :  { %619 = vmatprep.subr.bf16.mxu0 %v715_v1  ;;  %v91_v6 = vpack.c.bf16 %v84_v5, %v83_v4  ;;  %v723_v9 = vld [vmem:[#allocation7 + $0x30] sm:$0xff]   ;;  %641 = vmatprep.subr.bf16.mxu1 %v722_v8  ;;  %v724_v11 = vld [vmem:[#allocation7 + $0x28] sm:$0xff]   ;;  %v725_v12 = vld [vmem:[#allocation7 + $0x20] sm:$0xff]  }
  0x38   :  { %v719_v10 = vld [vmem:[#allocation5 + $0x10] sm:$0xff]   ;;  %642 = vmatpush3.bf16.msra.mxu1 %v722_v8  ;;  %v720_v13 = vld [vmem:[#allocation5 + $0x8] sm:$0xff]   ;;  %v726_v14 = vld [vmem:[#allocation7 + $0x18] sm:$0xff]  }
  0x39   :  { %633 = vmatprep.mubr.bf16.mxu0 %v91_v6  ;;  %643 = vmatprep.subr.bf16.mxu1 %v723_v9  ;;  %v721_v15 = vld [vmem:[#allocation5] sm:$0xff]   ;;  %v85_v16 = vld [vmem:[#allocation2 + $0x10] sm:$0xff]  ;;  %v86_v17 = vld [vmem:[#allocation2 + $0x18] sm:$0xff] }
  0x3a   :  { %620 = vmatpush3.bf16.msra.mxu0 %v715_v1  ;;  %v87_v18 = vld [vmem:[#allocation2 + $0x20] sm:$0xff]  ;;  %v88_v19 = vld [vmem:[#allocation2 + $0x28] sm:$0xff]  ;;  %v92_v20 = vpack.c.bf16 %v86_v17, %v85_v16  ;;  %v89_v22 = vld [vmem:[#allocation2 + $0x30] sm:$0xff] }
  0x3b   :  { %621 = vmatprep.subr.bf16.mxu0 %v716_v2  ;;  %v93_v21 = vpack.c.bf16 %v88_v19, %v87_v18  ;;  %v90_v23 = vld [vmem:[#allocation2 + $0x38] sm:$0xff]  ;;  %v727_v25 = vld [vmem:[#allocation7 + $0x10] sm:$0xff]   ;;  %v728_v26 = vld [vmem:[#allocation7 + $0x8] sm:$0xff]  }
  0x3c   :  { %644 = vmatpush3.bf16.msra.mxu1 %v723_v9  ;;  %v94_v24 = vpack.c.bf16 %v90_v23, %v89_v22  ;;  %v729_v27 = vld [vmem:[#allocation7] sm:$0xff]   ;;  %v730_v28 = vld [vmem:[#allocation8 + $0x38] sm:$0xff]   ;;  %v731_v29 = vld [vmem:[#allocation8 + $0x30] sm:$0xff]  }
  0x3d   :  { %645 = vmatprep.subr.bf16.mxu1 %v724_v11  ;;  %v732_v30 = vld [vmem:[#allocation8 + $0x28] sm:$0xff]   ;;  %v733_v31 = vld [vmem:[#allocation8 + $0x20] sm:$0xff]   ;;  %v734_v32 = vld [vmem:[#allocation8 + $0x18] sm:$0xff]  }
  0x3e   :  { %622 = vmatpush3.bf16.msra.mxu0 %v716_v2  ;;  %v554_v35 = vld [vmem:[%s936_s2] ss:$0 sm:$0xff]  ;;  %v735_v62 = vld [vmem:[#allocation8 + $0x10] sm:$0xff]   ;;  %v736_v63 = vld [vmem:[#allocation8 + $0x8] sm:$0xff]  }
  0x3f   :  { %623 = vmatprep.subr.bf16.mxu0 %v717_v3  ;;  %v737_v0 = vld [vmem:[#allocation8] sm:$0xff]  }
  0x40   :  { %646 = vmatpush3.bf16.msra.mxu1 %v724_v11 }
  0x41   :  { %647 = vmatprep.subr.bf16.mxu1 %v725_v12 }
  0x42   :  { %624 = vmatpush3.bf16.msra.mxu0 %v717_v3  ;;  %v563_v3 = vld [vmem:[%s938_s4] ss:$0 sm:$0xff] }
  0x43   :  { %625 = vmatprep.subr.bf16.mxu0 %v718_v7 }
  0x44   :  { %648 = vmatpush3.bf16.msra.mxu1 %v725_v12 }
  0x45   :  { %649 = vmatprep.subr.bf16.mxu1 %v726_v14 }
  0x46   :  { %626 = vmatpush3.bf16.msra.mxu0 %v718_v7 }
  0x47   :  { %627 = vmatprep.subr.bf16.mxu0 %v719_v10 }
  0x48   :  { %650 = vmatpush3.bf16.msra.mxu1 %v726_v14 }
  0x49   :  { %651 = vmatprep.subr.bf16.mxu1 %v727_v25 }
  0x4a   :  { %628 = vmatpush3.bf16.msra.mxu0 %v719_v10 }
  0x4b   :  { %629 = vmatprep.subr.bf16.mxu0 %v720_v13 }
  0x4c   :  { %652 = vmatpush3.bf16.msra.mxu1 %v727_v25 }
  0x4d   :  { %653 = vmatprep.subr.bf16.mxu1 %v728_v26 }
  0x4e   :  { %630 = vmatpush3.bf16.msra.mxu0 %v720_v13 }
  0x4f   :  { %631 = vmatprep.subr.bf16.mxu0 %v721_v15 }
  0x50   :  { %654 = vmatpush3.bf16.msra.mxu1 %v728_v26 }
  0x51   :  { %655 = vmatprep.subr.bf16.mxu1 %v729_v27 }
  0x52   :  { %632 = vmatpush3.bf16.msra.mxu0 %v721_v15 }
  0x53   :  { %665 = vmatprep.subr.bf16.mxu0 %v730_v28 }
  0x54   :  { %656 = vmatpush3.bf16.msra.mxu1 %v729_v27 }
  0x55   :  { %634 = vmatmul.mubr.bf16.vlgmr.msra.gmra.mxu0 %v92_v20  ;;  %689 = vmatprep.subr.bf16.mxu1 %v730_v28 }
  0x56   :  { %637 = vmatprep.mubr.bf16.mxu0 %v93_v21  ;;  %666 = vmatpush3.bf16.msra.mxu0 %v730_v28 }
  0x57   :  { %667 = vmatprep.subr.bf16.mxu0 %v731_v29 }
  0x5a   :  { %668 = vmatpush3.bf16.msra.mxu0 %v731_v29 }
  0x5b   :  { %669 = vmatprep.subr.bf16.mxu0 %v732_v30 }
  0x5d   :  { %638 = vmatmul.mubr.bf16.gmra.mxu0 %v94_v24 }
  0x5e   :  { %670 = vmatpush3.bf16.msra.mxu0 %v732_v30 }
  0x5f   :  { %671 = vmatprep.subr.bf16.mxu0 %v733_v31 }
  0x62   :  { %672 = vmatpush3.bf16.msra.mxu0 %v733_v31 }
  0x63   :  { %673 = vmatprep.subr.bf16.mxu0 %v734_v32 }
  0x66   :  { %674 = vmatpush3.bf16.msra.mxu0 %v734_v32 }
  0x67   :  { %675 = vmatprep.subr.bf16.mxu0 %v735_v62 }
  0x6a   :  { %676 = vmatpush3.bf16.msra.mxu0 %v735_v62 }
  0x6b   :  { %677 = vmatprep.subr.bf16.mxu0 %v736_v63 }
  0x6e   :  { %678 = vmatpush3.bf16.msra.mxu0 %v736_v63 }
  0x6f   :  { %679 = vmatprep.subr.bf16.mxu0 %v737_v0 }
  0x72   :  { %680 = vmatpush3.bf16.msra.mxu0 %v737_v0 }
 0x115   :  { %v635_v33 = vpop.f32.mrf.mxu0 }
 0x116   :  { %v209_v39 = vadd.f32 %v635_v33, %v554_v35 }
 0x117   :  { %v200_v34 = vpop.f32.mrf.mxu0 }
 0x118   :  { %v201_v37 = vadd.f32 %v554_v35, %v200_v34  ;;  %v233_v46 = vmax.f32 %v209_v39, 0.0 }
 0x119   :  { %v636_v36 = vpop.f32.mrf.mxu0 }
 0x11a   :  { %v212_v38 = vadd.f32 %v636_v36, %v554_v35  ;;  %v231_v44 = vmax.f32 %v201_v37, 0.0 }
 0x11b   :  { %v203_v40 = vpop.f32.mrf.mxu0 }
 0x11c   :  { %v204_v41 = vadd.f32 %v554_v35, %v203_v40  ;;  %v234_v42 = vmax.f32 %v212_v38, 0.0 }
 0x11d   :  { %v639_v43 = vpop.f32.mrf.mxu0 }
 0x11e   :  { %v232_v45 = vmax.f32 %v204_v41, 0.0  ;;  %v240_v49 = vpack.c.bf16 %v234_v42, %v233_v46  ;;  %v225_v53 = vadd.f32 %v639_v43, %v554_v35 }
 0x11f   :  { %v216_v47 = vpop.f32.mrf.mxu0 }
 0x120   :  { %v239_v48 = vpack.c.bf16 %v232_v45, %v231_v44  ;;  %v217_v51 = vadd.f32 %v554_v35, %v216_v47  ;;  %v237_v59 = vmax.f32 %v225_v53, 0.0 }
 0x121   :  { %v640_v50 = vpop.f32.mrf.mxu0 }
 0x122   :  { %v228_v52 = vadd.f32 %v640_v50, %v554_v35  ;;  %657 = vmatprep.mubr.bf16.mxu1 %v239_v48  ;;  %v235_v57 = vmax.f32 %v217_v51, 0.0 }
 0x123   :  { %v219_v54 = vpop.f32.mrf.mxu0  ;;  %658 = vmatmul.mubr.bf16.vlgmr.msra.gmra.mxu1 %v240_v49 }
 0x124   :  { %v220_v55 = vadd.f32 %v554_v35, %v219_v54  ;;  %697 = vmatpush3.bf16.msra.mxu1 %v730_v28  ;;  %v238_v56 = vmax.f32 %v228_v52, 0.0 }
 0x125   :  { %690 = vmatprep.subr.bf16.mxu1 %v731_v29 }
 0x126   :  { %v236_v58 = vmax.f32 %v220_v55, 0.0  ;;  %v242_v61 = vpack.c.bf16 %v238_v56, %v237_v59 }
 0x128   :  { %v241_v60 = vpack.c.bf16 %v236_v58, %v235_v57  ;;  %698 = vmatpush3.bf16.msra.mxu1 %v731_v29 }
 0x129   :  { %691 = vmatprep.subr.bf16.mxu1 %v732_v30 }
 0x12a   :  { %661 = vmatprep.mubr.bf16.mxu1 %v241_v60 }
 0x12b   :  { %662 = vmatmul.mubr.bf16.gmra.mxu1 %v242_v61 }
 0x12c   :  { %699 = vmatpush3.bf16.msra.mxu1 %v732_v30  ;;  %v572_v30 = vld [vmem:[%s940_s6] ss:$0 sm:$0xff]  ;;  %s540_s6 = sshll.u32 %s854_s25, 4  ;;  %s541_s6 = int_to_ptr.vmem [resolvable:$true] %s540_s6 }
 0x12d   :  { %692 = vmatprep.subr.bf16.mxu1 %v733_v31  ;;  %s818_s26 = scalar_lea.vmem %s541_s6, 1024  ;;  %p823_p7 = scmp.lt.s32.totalorder %s541_s6, %s541_s6 }
 0x12e   :  { %p819_p6 = scmp.ne.s32.totalorder %s541_s6, %s818_s26  ;;  %p824_p8 = scmp.lt.s32.totalorder %s818_s26, %s818_s26 }
 0x130   :  { %700 = vmatpush3.bf16.msra.mxu1 %v733_v31  ;;  %p825_p9 = por %p824_p8, %p823_p7 }
 0x131   :  { %693 = vmatprep.subr.bf16.mxu1 %v734_v32 }
 0x132   :  { %p826_p10 = pnand %p825_p9, %p819_p6 }
 0x134   :  { %701 = vmatpush3.bf16.msra.mxu1 %v734_v32 }
 0x135   :  { %694 = vmatprep.subr.bf16.mxu1 %v735_v62 }
 0x138   :  { %702 = vmatpush3.bf16.msra.mxu1 %v735_v62 }
 0x139   :  { %695 = vmatprep.subr.bf16.mxu1 %v736_v63 }
 0x13c   :  { %703 = vmatpush3.bf16.msra.mxu1 %v736_v63 }
 0x13d   :  { %696 = vmatprep.subr.bf16.mxu1 %v737_v0 }
 0x140   :  { %704 = vmatpush3.bf16.msra.mxu1 %v737_v0 }
 0x1e3   :  { %v659_v1 = vpop.f32.mrf.mxu1 }
 0x1e4   :  { %v357_v7 = vadd.f32 %v659_v1, %v563_v3 }
 0x1e5   :  { %v348_v2 = vpop.f32.mrf.mxu1 }
 0x1e6   :  { %v349_v5 = vadd.f32 %v563_v3, %v348_v2  ;;  %v381_v14 = vmax.f32 %v357_v7, 0.0 }
 0x1e7   :  { %v660_v4 = vpop.f32.mrf.mxu1 }
 0x1e8   :  { %v360_v6 = vadd.f32 %v660_v4, %v563_v3  ;;  %v379_v12 = vmax.f32 %v349_v5, 0.0 }
 0x1e9   :  { %v351_v8 = vpop.f32.mrf.mxu1 }
 0x1ea   :  { %v352_v9 = vadd.f32 %v563_v3, %v351_v8  ;;  %v382_v10 = vmax.f32 %v360_v6, 0.0 }
 0x1eb   :  { %v663_v11 = vpop.f32.mrf.mxu1 }
 0x1ec   :  { %v380_v13 = vmax.f32 %v352_v9, 0.0  ;;  %v388_v17 = vpack.c.bf16 %v382_v10, %v381_v14  ;;  %v373_v21 = vadd.f32 %v663_v11, %v563_v3 }
 0x1ed   :  { %v364_v15 = vpop.f32.mrf.mxu1 }
 0x1ee   :  { %v387_v16 = vpack.c.bf16 %v380_v13, %v379_v12  ;;  %v365_v19 = vadd.f32 %v563_v3, %v364_v15  ;;  %v385_v27 = vmax.f32 %v373_v21, 0.0 }
 0x1ef   :  { %v664_v18 = vpop.f32.mrf.mxu1 }
 0x1f0   :  { %v376_v20 = vadd.f32 %v664_v18, %v563_v3  ;;  %681 = vmatprep.mubr.bf16.mxu0 %v387_v16  ;;  %v383_v25 = vmax.f32 %v365_v19, 0.0 }
 0x1f1   :  { %v367_v22 = vpop.f32.mrf.mxu1  ;;  %682 = vmatmul.mubr.bf16.vlgmr.msra.gmra.mxu0 %v388_v17 }
 0x1f2   :  { %v368_v23 = vadd.f32 %v563_v3, %v367_v22  ;;  %v386_v24 = vmax.f32 %v376_v20, 0.0 }
 0x1f4   :  { %v384_v26 = vmax.f32 %v368_v23, 0.0  ;;  %v390_v29 = vpack.c.bf16 %v386_v24, %v385_v27 }
 0x1f6   :  { %v389_v28 = vpack.c.bf16 %v384_v26, %v383_v25 }
 0x1f8   :  { %685 = vmatprep.mubr.bf16.mxu1 %v389_v28 }
 0x1f9   :  { %686 = vmatmul.mubr.bf16.vlgmr.msra.gmra.mxu1 %v390_v29 }
 0x2b1   :  { %v683_v31 = vpop.f32.mrf.mxu0 }
 0x2b2   :  { %v505_v32 = vadd.f32 %v683_v31, %v572_v30 }
 0x2b3   :  { %v496_v33 = vpop.f32.mrf.mxu0 }
 0x2b4   :  { %529 = vst [vmem:[#allocation10 + $0x10] sm:$0xff] %v505_v32  ;;  %v497_v34 = vadd.f32 %v572_v30, %v496_v33 }
 0x2b5   :  { %v684_v35 = vpop.f32.mrf.mxu0 }
 0x2b6   :  { %527 = vst [vmem:[#allocation10] sm:$0xff] %v497_v34  ;;  %v508_v36 = vadd.f32 %v684_v35, %v572_v30 }
 0x2b7   :  { %v499_v37 = vpop.f32.mrf.mxu0 }
 0x2b8   :  { %530 = vst [vmem:[#allocation10 + $0x18] sm:$0xff] %v508_v36  ;;  %v500_v38 = vadd.f32 %v572_v30, %v499_v37 }
 0x2b9   :  { %v687_v39 = vpop.f32.mrf.mxu1 }
 0x2ba   :  { %528 = vst [vmem:[#allocation10 + $0x8] sm:$0xff] %v500_v38  ;;  %v521_v40 = vadd.f32 %v687_v39, %v572_v30 }
 0x2bb   :  { %v512_v41 = vpop.f32.mrf.mxu1 }
 0x2bc   :  { %533 = vst [vmem:[#allocation10 + $0x30] sm:$0xff] %v521_v40  ;;  %v513_v42 = vadd.f32 %v572_v30, %v512_v41 }
 0x2bd   :  { %v688_v43 = vpop.f32.mrf.mxu1 }
 0x2be   :  { %531 = vst [vmem:[#allocation10 + $0x20] sm:$0xff] %v513_v42  ;;  %v524_v44 = vadd.f32 %v688_v43, %v572_v30 }
 0x2bf   :  { %v515_v45 = vpop.f32.mrf.mxu1 }
 0x2c0   :  { %534 = vst [vmem:[#allocation10 + $0x38] sm:$0xff] %v524_v44  ;;  %v516_v46 = vadd.f32 %v572_v30, %v515_v45 }
 0x2c2   :  { %532 = vst [vmem:[#allocation10 + $0x28] sm:$0xff] %v516_v46 }
 0x2c3   :  { %829 = shalt.err (!%p826_p10)
}
 0x2c4   :  { %546 = dma.vmem_to_hbm [thread:$0]  %s541_s6, 1024, %s941_s7, [#allocation4], %s850_s11, %s850_s11, %s851_s12  }
 0x2c5   :  { %844 = dma.done.wait [#allocation4], 1024  }
 0x2c6   :  { %845 = vsyncadd [#allocation4], 4294966272 }
 0x2c7   :  { %550 = vsyncpa [#allocation3], 1 }
 0x2c8   :  { %551 = vsyncpa [#allocation6], 1 }
 0x2c9   :  { %552 = vsyncpa [#allocation9], 1 }
 0x2ca   :  { %553 = vsyncpa [#allocation4], 1 }

</bundles_post_ra>
